<compile_context>
chip_gen: v7x
topology: tpu7x:2x2x1
jax: 0.10.0
libtpu: 0.0.40
codegen_flags: <defaults>
</compile_context>

<pallas_src>
import jax
import jax.numpy as jnp
from jax.experimental import pallas as pl
from jax.experimental.pallas import tpu as pltpu

EPS = 1e-10
_TILE_TARGET_BYTES = 1 * 1024 * 1024       # ~1 MiB tiles: fits all generations incl. v7x
_VMEM_LIMIT_BYTES = 32 * 1024 * 1024       # explicit (v5e scoped default is only 16 MiB)


def _round_up(a, b):
    return (a + b - 1) // b * b


# ----------------------------- batch norm kernels -----------------------------
def _stats_kernel(x_ref, s_ref):
    # x_ref: (TM, Dp) row tile; s_ref: (2, Dp) resident accumulator (sum, sumsq).
    @pl.when(pl.program_id(0) == 0)
    def _():
        s_ref[...] = jnp.zeros_like(s_ref)

    x = x_ref[...].astype(jnp.float32)
    psum = jnp.sum(x, axis=0, keepdims=True)        # (1, Dp)
    psq = jnp.sum(x * x, axis=0, keepdims=True)     # (1, Dp)
    s_ref[...] = s_ref[...] + jnp.concatenate([psum, psq], axis=0)


def _normalize_kernel(sb_ref, x_ref, o_ref):
    # sb_ref: (2, Dp) [scale; bias] (resident, same block every step)
    # x_ref / o_ref: (TM, Dp)
    x = x_ref[...].astype(jnp.float32)
    scale = sb_ref[0:1, :]
    bias = sb_ref[1:2, :]
    o_ref[...] = (x * scale + bias).astype(o_ref.dtype)


def _choose_tm(rows_f, dp):
    tm = _TILE_TARGET_BYTES // (dp * 4)
    tm = max(16, (tm // 16) * 16)                   # 16: valid sublane tiling for f32 & bf16
    tm = min(tm, _round_up(rows_f, 16))
    return tm


def norm1d_batch(x):
    """BatchNorm1d(D, eps=1e-10, affine=False), training-mode forward. (B, L, D) -> (B, L, D)."""
    B, L, D = x.shape
    rows = B * L
    x2 = x.reshape(rows, D)

    # Lane-dense folding: pack k rows into the lane axis when D < 128 and divides 128.
    k = 128 // D if (D < 128 and 128 % D == 0) else 1
    rows_k = _round_up(rows, k)
    if rows_k != rows:
        # Zero rows contribute 0 to sum / sumsq; we divide by the true count below.
        x2 = jnp.pad(x2, ((0, rows_k - rows), (0, 0)))
    dp = k * D
    rows_f = rows_k // k
    xf = x2.reshape(rows_f, dp)

    tm = _choose_tm(rows_f, dp)
    rows_p = _round_up(rows_f, tm)
    if rows_p != rows_f:
        xf = jnp.pad(xf, ((0, rows_p - rows_f), (0, 0)))
    grid = rows_p // tm

    # ---- pass 1: per-lane-column sum / sum-of-squares (tiled, pipelined) ----
    stats = pl.pallas_call(
        _stats_kernel,
        out_shape=jax.ShapeDtypeStruct((2, dp), jnp.float32),
        grid_spec=pltpu.PrefetchScalarGridSpec(
            num_scalar_prefetch=0,
            grid=(grid,),
            in_specs=[pl.BlockSpec((tm, dp), lambda i: (i, 0))],
            out_specs=pl.BlockSpec((2, dp), lambda i: (0, 0)),
        ),
        compiler_params=pltpu.CompilerParams(
            dimension_semantics=("arbitrary",),
            vmem_limit_bytes=_VMEM_LIMIT_BYTES,
        ),
    )(xf)

    # ---- finalize: tiny (2, D) arrays, plain XLA ops ----
    n = jnp.float32(rows)
    s = stats.reshape(2, k, D).sum(axis=1)                    # fold partial sums -> per-feature
    mean = s[0] / n
    var = jnp.maximum(s[1] / n - mean * mean, 0.0)            # biased variance
    scale = jax.lax.rsqrt(var + EPS)
    bias = -mean * scale
    sb = jnp.tile(jnp.stack([scale, bias], axis=0), (1, k))   # (2, dp), folded lane layout

    # ---- pass 2: normalize (independent row tiles -> "parallel" for v7x's 2 TCs) ----
    out = pl.pallas_call(
        _normalize_kernel,
        out_shape=jax.ShapeDtypeStruct((rows_p, dp), x.dtype),
        grid_spec=pltpu.PrefetchScalarGridSpec(
            num_scalar_prefetch=0,
            grid=(grid,),
            in_specs=[pl.BlockSpec((2, dp), lambda i: (0, 0)),
                      pl.BlockSpec((tm, dp), lambda i: (i, 0))],
            out_specs=pl.BlockSpec((tm, dp), lambda i: (i, 0)),
        ),
        compiler_params=pltpu.CompilerParams(
            dimension_semantics=("parallel",),
            vmem_limit_bytes=_VMEM_LIMIT_BYTES,
        ),
    )(sb, xf)

    out = out[:rows_f].reshape(rows_k, D)[:rows]
    return out.reshape(B, L, D)


# --------------------------- instance norm kernel ----------------------------
def _instancenorm_kernel(x_ref, o_ref):
    # x_ref: (BB, L, D) -- BB batch elements per grid step; stats per (b, d) over L.
    x = x_ref[...].astype(jnp.float32)
    mean = jnp.mean(x, axis=1, keepdims=True)                 # (BB, 1, D)
    xc = x - mean
    var = jnp.mean(xc * xc, axis=1, keepdims=True)            # biased variance
    o_ref[...] = (xc * jax.lax.rsqrt(var + EPS)).astype(o_ref.dtype)


def norm1d_instance(x):
    """InstanceNorm1d(D, eps=1e-10, affine=False) forward. (B, L, D) -> (B, L, D)."""
    B, L, D = x.shape
    elem_bytes = L * D * 4
    bb = max(1, min(B, _TILE_TARGET_BYTES // max(elem_bytes, 1)))
    bp = _round_up(B, bb)
    xp = x if bp == B else jnp.pad(x, ((0, bp - B), (0, 0), (0, 0)))
    # TODO(synk): add an L-tiled two-pass path when a single (1, L, D) f32 tile exceeds
    #             the VMEM budget (very large L*D on v7x's 64 MiB VMEM).

    out = pl.pallas_call(
        _instancenorm_kernel,
        out_shape=jax.ShapeDtypeStruct((bp, L, D), x.dtype),
        grid_spec=pltpu.PrefetchScalarGridSpec(
            num_scalar_prefetch=0,
            grid=(bp // bb,),
            in_specs=[pl.BlockSpec((bb, L, D), lambda b: (b, 0, 0))],
            out_specs=pl.BlockSpec((bb, L, D), lambda b: (b, 0, 0)),
        ),
        compiler_params=pltpu.CompilerParams(
            dimension_semantics=("parallel",),
            vmem_limit_bytes=_VMEM_LIMIT_BYTES,
        ),
    )(xp)
    return out[:B]


def norm1d(x, ntype="batch"):
    # affine=False -> no learnable parameters.
    # TODO(synk): BatchNorm1d running_mean/running_var EMA buffer updates (training-mode
    #             side effect) are not modeled; forward output matches training mode.
    if ntype == "batch":
        return norm1d_batch(x)
    elif ntype == "instance":
        return norm1d_instance(x)
    raise ValueError(ntype)


# --------------------------------- reference ---------------------------------
def _ref_batch(x):
    xf = x.astype(jnp.float32)
    mean = jnp.mean(xf, axis=(0, 1), keepdims=True)
    var = jnp.mean((xf - mean) ** 2, axis=(0, 1), keepdims=True)
    return ((xf - mean) / jnp.sqrt(var + EPS)).astype(x.dtype)


def _ref_instance(x):
    xf = x.astype(jnp.float32)
    mean = jnp.mean(xf, axis=1, keepdims=True)
    var = jnp.mean((xf - mean) ** 2, axis=1, keepdims=True)
    return ((xf - mean) / jnp.sqrt(var + EPS)).astype(x.dtype)


if __name__ == "__main__":
    key = jax.random.PRNGKey(0)
    B, L, D = 2, 8, 32  # x: (batch, seq, dim) — dim is the normalized channel axis
    x = jax.random.normal(key, (B, L, D), dtype=jnp.float32)

    y_batch = jax.block_until_ready(norm1d(x, ntype="batch"))
    y_inst = jax.block_until_ready(norm1d(x, ntype="instance"))

    assert jnp.allclose(y_batch, _ref_batch(x), atol=1e-4, rtol=1e-4)
    assert jnp.allclose(y_inst, _ref_instance(x), atol=1e-4, rtol=1e-4)

    print("KERNEL_OK")
</pallas_src>

<mosaic_0001>
module attributes {stable_mosaic.version = 11 : i64} {
  func.func @_stats_kernel(%arg0: i32, %arg1: memref<16x128xf32, #tpu.memory_space<vmem>>, %arg2: memref<2x128xf32, #tpu.memory_space<vmem>>) attributes {dimension_semantics = [#tpu.dimension_semantics<arbitrary>], iteration_bounds = array<i64: 1>, scalar_prefetch = 0 : i64, scratch_operands = 0 : i64, tpu.core_type = #tpu.core_type<tc>, window_params = [{transform_indices = @transform_0, window_bounds = array<i64: 16, 128>}, {pipeline_mode = #tpu.pipeline_mode<synchronous>, transform_indices = @transform_1, window_bounds = array<i64: 2, 128>}]} {
    %c0_i32 = arith.constant 0 : i32
    %0 = arith.cmpi eq, %arg0, %c0_i32 : i32
    %1 = arith.extui %0 : i1 to i32
    %c0_i32_0 = arith.constant 0 : i32
    %2 = arith.cmpi ne, %1, %c0_i32_0 : i32
    scf.if %2 {
      %cst_7 = arith.constant 0.000000e+00 : f32
      %13 = vector.broadcast %cst_7 : f32 to vector<2x128xf32>
      %c0_8 = arith.constant 0 : index
      %c0_9 = arith.constant 0 : index
      %14 = vector.load %arg2[%c0_8, %c0_9] : memref<2x128xf32, #tpu.memory_space<vmem>>, vector<2x128xf32>
      tpu.vector_store %arg2[%c0_8, %c0_9], %13 {strides = array<i32>} : memref<2x128xf32, #tpu.memory_space<vmem>>, vector<2x128xf32>,
    } else {
    }
    %c0 = arith.constant 0 : index
    %c0_1 = arith.constant 0 : index
    %3 = vector.load %arg1[%c0, %c0_1] : memref<16x128xf32, #tpu.memory_space<vmem>>, vector<16x128xf32>
    %cst = arith.constant dense<0.000000e+00> : vector<128xf32>
    %4 = vector.multi_reduction <add>, %3, %cst [0] : vector<16x128xf32> to vector<128xf32>
    %5 = vector.shape_cast %4 : vector<128xf32> to vector<1x128xf32>
    %6 = arith.mulf %3, %3 : vector<16x128xf32>
    %cst_2 = arith.constant dense<0.000000e+00> : vector<128xf32>
    %7 = vector.multi_reduction <add>, %6, %cst_2 [0] : vector<16x128xf32> to vector<128xf32>
    %8 = vector.shape_cast %7 : vector<128xf32> to vector<1x128xf32>
    %c0_3 = arith.constant 0 : index
    %c0_4 = arith.constant 0 : index
    %9 = vector.load %arg2[%c0_3, %c0_4] : memref<2x128xf32, #tpu.memory_space<vmem>>, vector<2x128xf32>
    %10 = tpu.concatenate %5, %8 in 0 : vector<1x128xf32>, vector<1x128xf32> -> vector<2x128xf32>
    %11 = arith.addf %9, %10 : vector<2x128xf32>
    %c0_5 = arith.constant 0 : index
    %c0_6 = arith.constant 0 : index
    %12 = vector.load %arg2[%c0_5, %c0_6] : memref<2x128xf32, #tpu.memory_space<vmem>>, vector<2x128xf32>
    tpu.vector_store %arg2[%c0_5, %c0_6], %11 {strides = array<i32>} : memref<2x128xf32, #tpu.memory_space<vmem>>, vector<2x128xf32>,
    return
  }
  func.func @transform_0(%arg0: i32) -> (i32, i32) {
    %c0_i32 = arith.constant 0 : i32
    %c0_i32_0 = arith.constant 0 : i32
    return %arg0, %c0_i32 : i32, i32
  }
  func.func @transform_1(%arg0: i32) -> (i32, i32) {
    %c0_i32 = arith.constant 0 : i32
    %c0_i32_0 = arith.constant 0 : i32
    %c0_i32_1 = arith.constant 0 : i32
    return %c0_i32, %c0_i32_0 : i32, i32
  }
}

</mosaic_0001>

<bundles_post_ra>
// kernel: tpu_custom_call.1
= control target key start
LH: loop header
LB: loop body
LE: loop exit
PB: predicated region body
PF: predicated region fallthrough
CT: control target
= control target key end

     0   :  { %6 = vsyncpa [#allocation3], 0  ;;  %s158_s0 = inlined_call_operand.hbm [shape: f32[16,128], index: 0, kind: input, shape index: {}]   ;;  %s159_s1 = inlined_call_operand.hbm [shape: f32[2,128], index: 1, kind: output, shape index: {}]  }
   0x1   :  { %7 = vsyncpa [#allocation4], 0  ;;  %s119_s6 = smov [#allocation2]   ;;  %s71_s10 = scalar_lea.hbm %s158_s0, 256 }
   0x2   :  { %s13_s7 = sshll.u32 %s119_s6, 4  ;;  %p72_p0 = scmp.ne.s32.totalorder %s158_s0, %s71_s10  ;;  %s14_s7 = int_to_ptr.vmem [resolvable:$true] %s13_s7 }
   0x3   :  { %p75_p1 = scmp.lt.u32.totalorder %s71_s10, %s158_s0 }
   0x5   :  { %p77_p2 = pnand %p75_p1, %p72_p0 }
   0x7   :  { %80 = shalt.err (!%p77_p2)
}
   0x8   :  { %s81_s15 = scalar_lea.vmem %s14_s7, 256  ;;  %p86_p4 = scmp.lt.s32.totalorder %s14_s7, %s14_s7 }
   0x9   :  { %p82_p3 = scmp.ne.s32.totalorder %s14_s7, %s81_s15  ;;  %p87_p5 = scmp.lt.s32.totalorder %s81_s15, %s81_s15 }
   0xb   :  { %p88_p6 = por %p87_p5, %p86_p4 }
   0xd   :  { %p89_p7 = pnand %p88_p6, %p82_p3 }
   0xf   :  { %92 = shalt.err (!%p89_p7)
}
  0x10   :  { %s120_s16 = smov 128   ;;  %s121_s17 = smov 8  }
  0x11   :  { %19 = dma.hbm_to_vmem [thread:$0]  %s158_s0, 256, %s14_s7, [#allocation3], %s120_s16, %s120_s16, %s121_s17  }
  0x12   :  { %115 = dma.done.wait [#allocation3], 256  }
  0x13   :  { %116 = vsyncadd [#allocation3], 4294967040  ;;  %v122_v0 = vmov 0.0   ;;  %v28_v1 = vld [vmem:[#allocation2] sm:$0xff]  ;;  %v29_v2 = vld [vmem:[#allocation2 + $0x8] sm:$0xff]  ;;  %vm47_vm0 = vcmask 1040384  }
  0x14   :  { %27 = vst [vmem:[#allocation5] sm:$0x3] %v122_v0  ;;  %v30_v3 = vadd.f32 %v29_v2, %v28_v1  ;;  %v37_v4 = vmul.f32 %v28_v1, %v28_v1  ;;  %v38_v5 = vmul.f32 %v29_v2, %v29_v2  ;;  %s123_s0 = smov [#allocation5]  }
  0x15   :  { %s57_s20 = sshll.u32 %s123_s0, 4  ;;  %s58_s20 = int_to_ptr.vmem [resolvable:$true] %s57_s20 }
  0x16   :  { %v31_v6 = vrot.slane %v30_v3, 4  ;;  %v39_v7 = vadd.f32 %v38_v5, %v37_v4  ;;  %s93_s21 = scalar_lea.vmem %s58_s20, 32  ;;  %p98_p9 = scmp.lt.s32.totalorder %s58_s20, %s58_s20 }
  0x17   :  { %p94_p8 = scmp.ne.s32.totalorder %s58_s20, %s93_s21  ;;  %p99_p10 = scmp.lt.s32.totalorder %s93_s21, %s93_s21 }
  0x18   :  { %v32_v8 = vadd.f32 %v31_v6, %v30_v3  ;;  %v40_v9 = vrot.slane %v39_v7, 4 }
  0x19   :  { %p100_p11 = por %p99_p10, %p98_p9 }
  0x1a   :  { %v33_v10 = vrot.slane %v32_v8, 2  ;;  %v41_v11 = vadd.f32 %v40_v9, %v39_v7 }
  0x1b   :  { %v46_v19 = vld [vmem:[#allocation5] sm:$0x3]  ;;  %p101_p12 = pnand %p100_p11, %p94_p8 }
  0x1c   :  { %v34_v12 = vadd.f32 %v33_v10, %v32_v8  ;;  %v42_v13 = vrot.slane %v41_v11, 2 }
  0x1e   :  { %v35_v14 = vrot.slane %v34_v12, 1  ;;  %v43_v15 = vadd.f32 %v42_v13, %v41_v11 }
  0x20   :  { %v36_v16 = vadd.f32 %v35_v14, %v34_v12  ;;  %v44_v17 = vrot.slane %v43_v15, 1 }
  0x22   :  { %v45_v18 = vadd.f32 %v44_v17, %v43_v15 }
  0x24   :  { %v48_v20 = vsel %vm47_vm0, %v36_v16, %v45_v18 }
  0x25   :  { %v49_v21 = vadd.f32 %v48_v20, %v46_v19 }
  0x27   :  { %50 = vst [vmem:[#allocation5] sm:$0x3] %v49_v21 }
  0x28   :  { %104 = shalt.err (!%p101_p12)
}
  0x29   :  { %s105_s24 = scalar_lea.hbm %s159_s1, 32 }
  0x2a   :  { %p106_p13 = scmp.ne.s32.totalorder %s159_s1, %s105_s24  ;;  %p109_p0 = scmp.lt.u32.totalorder %s105_s24, %s159_s1 }
  0x2c   :  { %p111_p1 = pnand %p109_p0, %p106_p13 }
  0x2e   :  { %114 = shalt.err (!%p111_p1)
}
  0x2f   :  { %60 = dma.vmem_to_hbm [thread:$0]  %s58_s20, 32, %s159_s1, [#allocation4]  }
  0x30   :  { %117 = dma.done.wait [#allocation4], 32  }
  0x31   :  { %118 = vsyncadd [#allocation4], 4294967264 }
  0x32   :  { %64 = vsyncpa [#allocation3], 1 }
  0x33   :  { %65 = vsyncpa [#allocation4], 1 }

</bundles_post_ra>
